<compile_context>
chip_gen: v6e
topology: v6e:2x2x1
jax: 0.10.0
libtpu: 0.0.40
codegen_flags: <defaults>
</compile_context>

<pallas_src>
import math
from functools import partial

import jax
import jax.numpy as jnp
from jax import lax
from jax.experimental import pallas as pl
from jax.experimental.pallas import tpu as pltpu

EPS_BN = 1e-5


def _gating_kernel(
    x_mm_ref,    # (B, tk)  bf16   -- MXU operand (contraction tile of x)
    w_ref,       # (tk, tn) bf16   -- MXU operand (tile of gating_weights)
    x_res_ref,   # (B, tn)  f32    -- residual x tile for the final multiply
    scale_ref,   # (1, tn)  f32    -- BN gamma (or ones if no BN)
    shift_ref,   # (1, tn)  f32    -- BN beta  (or gating_biases if no BN)
    out_ref,     # (B, tn)  f32
    acc_ref,     # (B, tn)  f32 VMEM scratch accumulator
    *,
    add_batch_norm: bool,
):
    k = pl.program_id(1)

    @pl.when(k == 0)
    def _init():
        acc_ref[...] = jnp.zeros_like(acc_ref)

    # bf16 x bf16 -> f32 accumulate on the MXU.
    acc_ref[...] += jnp.dot(
        x_mm_ref[...], w_ref[...], preferred_element_type=jnp.float32
    )

    @pl.when(k == pl.num_programs(1) - 1)
    def _finalize():
        gates = acc_ref[...]                                   # (B, tn) f32
        if add_batch_norm:
            # Training-mode BatchNorm1d: per-feature stats over the batch dim.
            # The full batch lives inside this block, so stats are exact.
            mean = jnp.mean(gates, axis=0, keepdims=True)
            var = jnp.mean((gates - mean) ** 2, axis=0, keepdims=True)
            gates = (gates - mean) * lax.rsqrt(var + EPS_BN)   # EUP rsqrt
            gates = gates * scale_ref[...] + shift_ref[...]
        else:
            gates = gates + shift_ref[...]
        gates = jax.nn.sigmoid(gates)                          # EUP exp
        out_ref[...] = (x_res_ref[...] * gates).astype(out_ref.dtype)


def _pick_tile(dim: int) -> int:
    # Prefer 256 (v6e/v7x MXU is 2x256x256), then 128, else the full dim.
    for t in (256, 128):
        if dim % t == 0:
            return t
    return dim


def gating_context_forward(
    x,                   # (B, dim)  float
    gating_weights,      # (dim, dim)
    *,
    bn_gamma=None,       # (dim,)  used if add_batch_norm
    bn_beta=None,        # (dim,)  used if add_batch_norm
    gating_biases=None,  # (dim,)  used if not add_batch_norm
    add_batch_norm=True,
):
    x = jnp.asarray(x, jnp.float32)
    B, D = x.shape
    tn = _pick_tile(D)   # output-column tile (lane-dense)
    tk = _pick_tile(D)   # contraction tile

    # MXU feed in bf16 (halves DMA traffic for the big operands);
    # elementwise path keeps an f32 copy of x.
    x_bf16 = x.astype(jnp.bfloat16)
    w_bf16 = jnp.asarray(gating_weights, jnp.float32).astype(jnp.bfloat16)

    if add_batch_norm:
        scale = jnp.asarray(bn_gamma, jnp.float32).reshape(1, D)
        shift = jnp.asarray(bn_beta, jnp.float32).reshape(1, D)
    else:
        scale = jnp.ones((1, D), jnp.float32)
        shift = jnp.asarray(gating_biases, jnp.float32).reshape(1, D)

    grid = (D // tn, D // tk)
    kernel = partial(_gating_kernel, add_batch_norm=add_batch_norm)

    return pl.pallas_call(
        kernel,
        out_shape=jax.ShapeDtypeStruct((B, D), jnp.float32),
        grid_spec=pltpu.PrefetchScalarGridSpec(
            num_scalar_prefetch=0,
            grid=grid,
            in_specs=[
                pl.BlockSpec((B, tk), lambda j, k: (0, k)),   # x   (bf16, MXU)
                pl.BlockSpec((tk, tn), lambda j, k: (k, j)),  # W   (bf16, MXU)
                pl.BlockSpec((B, tn), lambda j, k: (0, j)),   # x   (f32, residual)
                pl.BlockSpec((1, tn), lambda j, k: (0, j)),   # BN scale
                pl.BlockSpec((1, tn), lambda j, k: (0, j)),   # BN shift / bias
            ],
            out_specs=pl.BlockSpec((B, tn), lambda j, k: (0, j)),
            scratch_shapes=[pltpu.VMEM((B, tn), jnp.float32)],
        ),
        compiler_params=pltpu.CompilerParams(
            dimension_semantics=("parallel", "arbitrary"),
            vmem_limit_bytes=32 * 1024 * 1024,   # fits all generations incl. v7x
        ),
    )(x_bf16, w_bf16, x, scale, shift)


def _reference(x, w, gamma, beta):
    """Pure-JAX reference with the same bf16-MXU / f32-elementwise recipe."""
    gates = jnp.dot(
        x.astype(jnp.bfloat16), w.astype(jnp.bfloat16),
        preferred_element_type=jnp.float32,
    )
    mean = jnp.mean(gates, axis=0, keepdims=True)
    var = jnp.mean((gates - mean) ** 2, axis=0, keepdims=True)
    gates = (gates - mean) * lax.rsqrt(var + EPS_BN)
    gates = gates * gamma.reshape(1, -1) + beta.reshape(1, -1)
    gates = jax.nn.sigmoid(gates)
    return x * gates


if __name__ == "__main__":
    # Small shapes consistent with GatingContext (x: (batch, dim)).
    B, DIM = 8, 512   # -> grid (2, 2) with 256x256 tiles

    key = jax.random.PRNGKey(0)
    kx, kw = jax.random.split(key, 2)

    x = jax.random.normal(kx, (B, DIM), jnp.float32)
    gating_weights = (
        jax.random.normal(kw, (DIM, DIM), jnp.float32) / math.sqrt(DIM)
    )
    # BatchNorm1d affine defaults (weight=1, bias=0), training-mode statistics.
    bn_gamma = jnp.ones((DIM,), jnp.float32)
    bn_beta = jnp.zeros((DIM,), jnp.float32)

    out = gating_context_forward(
        x, gating_weights, bn_gamma=bn_gamma, bn_beta=bn_beta,
        add_batch_norm=True,
    )
    out = jax.block_until_ready(out)
    assert out.shape == (B, DIM)

    ref = _reference(x, gating_weights, bn_gamma, bn_beta)
    assert jnp.allclose(out, ref, atol=2e-3, rtol=2e-3), (
        float(jnp.max(jnp.abs(out - ref)))
    )

    print("KERNEL_OK")
</pallas_src>

<mosaic_0001>
module attributes {stable_mosaic.version = 11 : i64} {
  func.func @_gating_kernel(%arg0: i32, %arg1: i32, %arg2: memref<8x256xbf16, #tpu.memory_space<vmem>>, %arg3: memref<256x256xbf16, #tpu.memory_space<vmem>>, %arg4: memref<8x256xf32, #tpu.memory_space<vmem>>, %arg5: memref<1x256xf32, #tpu.memory_space<vmem>>, %arg6: memref<1x256xf32, #tpu.memory_space<vmem>>, %arg7: memref<8x256xf32, #tpu.memory_space<vmem>>, %arg8: memref<8x256xf32, #tpu.memory_space<vmem>>) attributes {dimension_semantics = [#tpu.dimension_semantics<parallel>, #tpu.dimension_semantics<arbitrary>], iteration_bounds = array<i64: 2, 2>, scalar_prefetch = 0 : i64, scratch_operands = 1 : i64, tpu.core_type = #tpu.core_type<tc>, window_params = [{transform_indices = @transform_0, window_bounds = array<i64: 8, 256>}, {transform_indices = @transform_1, window_bounds = array<i64: 256, 256>}, {transform_indices = @transform_2, window_bounds = array<i64: 8, 256>}, {transform_indices = @transform_3, window_bounds = array<i64: 1, 256>}, {transform_indices = @transform_4, window_bounds = array<i64: 1, 256>}, {transform_indices = @transform_5, window_bounds = array<i64: 8, 256>}]} {
    %c0_i32 = arith.constant 0 : i32
    %0 = arith.cmpi eq, %arg1, %c0_i32 : i32
    %1 = arith.extui %0 : i1 to i32
    %c0_i32_0 = arith.constant 0 : i32
    %2 = arith.cmpi ne, %1, %c0_i32_0 : i32
    scf.if %2 {
      %cst_9 = arith.constant 0.000000e+00 : f32
      %12 = vector.broadcast %cst_9 : f32 to vector<8x256xf32>
      %c0_10 = arith.constant 0 : index
      %c0_11 = arith.constant 0 : index
      %13 = vector.load %arg8[%c0_10, %c0_11] : memref<8x256xf32, #tpu.memory_space<vmem>>, vector<8x256xf32>
      tpu.vector_store %arg8[%c0_10, %c0_11], %12 {strides = array<i32>} : memref<8x256xf32, #tpu.memory_space<vmem>>, vector<8x256xf32>,
    } else {
    }
    %c0 = arith.constant 0 : index
    %c0_1 = arith.constant 0 : index
    %3 = vector.load %arg8[%c0, %c0_1] : memref<8x256xf32, #tpu.memory_space<vmem>>, vector<8x256xf32>
    %c0_2 = arith.constant 0 : index
    %c0_3 = arith.constant 0 : index
    %4 = vector.load %arg2[%c0_2, %c0_3] : memref<8x256xbf16, #tpu.memory_space<vmem>>, vector<8x256xbf16>
    %c0_4 = arith.constant 0 : index
    %c0_5 = arith.constant 0 : index
    %5 = vector.load %arg3[%c0_4, %c0_5] : memref<256x256xbf16, #tpu.memory_space<vmem>>, vector<256x256xbf16>
    %cst = arith.constant dense<0.000000e+00> : vector<8x256xf32>
    %6 = tpu.matmul %4, %5, %cst {dimension_numbers = #tpu.dot_dimension_numbers<[1], [0], [0], [1], [0, 0, 1, 1], [], []>} : vector<8x256xbf16>, vector<256x256xbf16>, vector<8x256xf32> -> vector<8x256xf32>
    %7 = arith.addf %3, %6 : vector<8x256xf32>
    %c0_6 = arith.constant 0 : index
    %c0_7 = arith.constant 0 : index
    %8 = vector.load %arg8[%c0_6, %c0_7] : memref<8x256xf32, #tpu.memory_space<vmem>>, vector<8x256xf32>
    tpu.vector_store %arg8[%c0_6, %c0_7], %7 {strides = array<i32>} : memref<8x256xf32, #tpu.memory_space<vmem>>, vector<8x256xf32>,
    %c1_i32 = arith.constant 1 : i32
    %9 = arith.cmpi eq, %arg1, %c1_i32 : i32
    %10 = arith.extui %9 : i1 to i32
    %c0_i32_8 = arith.constant 0 : i32
    %11 = arith.cmpi ne, %10, %c0_i32_8 : i32
    scf.if %11 {
      %c0_9 = arith.constant 0 : index
      %c0_10 = arith.constant 0 : index
      %12 = vector.load %arg8[%c0_9, %c0_10] : memref<8x256xf32, #tpu.memory_space<vmem>>, vector<8x256xf32>
      %cst_11 = arith.constant dense<0.000000e+00> : vector<256xf32>
      %13 = vector.multi_reduction <add>, %12, %cst_11 [0] : vector<8x256xf32> to vector<256xf32>
      %14 = vector.shape_cast %13 : vector<256xf32> to vector<1x256xf32>
      %cst_12 = arith.constant 8.000000e+00 : f32
      %15 = vector.broadcast %cst_12 : f32 to vector<1x256xf32>
      %16 = arith.divf %14, %15 : vector<1x256xf32>
      %17 = vector.broadcast %16 : vector<1x256xf32> to vector<8x256xf32>
      %18 = arith.subf %12, %17 : vector<8x256xf32>
      %19 = arith.mulf %18, %18 : vector<8x256xf32>
      %cst_13 = arith.constant dense<0.000000e+00> : vector<256xf32>
      %20 = vector.multi_reduction <add>, %19, %cst_13 [0] : vector<8x256xf32> to vector<256xf32>
      %21 = vector.shape_cast %20 : vector<256xf32> to vector<1x256xf32>
      %cst_14 = arith.constant 8.000000e+00 : f32
      %22 = vector.broadcast %cst_14 : f32 to vector<1x256xf32>
      %23 = arith.divf %21, %22 : vector<1x256xf32>
      %24 = vector.broadcast %16 : vector<1x256xf32> to vector<8x256xf32>
      %25 = arith.subf %12, %24 : vector<8x256xf32>
      %cst_15 = arith.constant 9.99999974E-6 : f32
      %26 = vector.broadcast %cst_15 : f32 to vector<1x256xf32>
      %27 = arith.addf %23, %26 : vector<1x256xf32>
      %28 = math.rsqrt %27 : vector<1x256xf32>
      %29 = vector.broadcast %28 : vector<1x256xf32> to vector<8x256xf32>
      %30 = arith.mulf %25, %29 : vector<8x256xf32>
      %c0_16 = arith.constant 0 : index
      %c0_17 = arith.constant 0 : index
      %31 = vector.load %arg5[%c0_16, %c0_17] : memref<1x256xf32, #tpu.memory_space<vmem>>, vector<1x256xf32>
      %32 = vector.broadcast %31 : vector<1x256xf32> to vector<8x256xf32>
      %33 = arith.mulf %30, %32 : vector<8x256xf32>
      %c0_18 = arith.constant 0 : index
      %c0_19 = arith.constant 0 : index
      %34 = vector.load %arg6[%c0_18, %c0_19] : memref<1x256xf32, #tpu.memory_space<vmem>>, vector<1x256xf32>
      %35 = vector.broadcast %34 : vector<1x256xf32> to vector<8x256xf32>
      %36 = arith.addf %33, %35 : vector<8x256xf32>
      %37 = arith.negf %36 : vector<8x256xf32>
      %38 = math.exp %37 : vector<8x256xf32>
      %cst_20 = arith.constant 1.000000e+00 : f32
      %39 = vector.broadcast %cst_20 : f32 to vector<8x256xf32>
      %40 = arith.addf %39, %38 : vector<8x256xf32>
      %41 = arith.divf %39, %40 : vector<8x256xf32>
      %c0_21 = arith.constant 0 : index
      %c0_22 = arith.constant 0 : index
      %42 = vector.load %arg4[%c0_21, %c0_22] : memref<8x256xf32, #tpu.memory_space<vmem>>, vector<8x256xf32>
      %43 = arith.mulf %42, %41 : vector<8x256xf32>
      %c0_23 = arith.constant 0 : index
      %c0_24 = arith.constant 0 : index
      %44 = vector.load %arg7[%c0_23, %c0_24] : memref<8x256xf32, #tpu.memory_space<vmem>>, vector<8x256xf32>
      tpu.vector_store %arg7[%c0_23, %c0_24], %43 {strides = array<i32>} : memref<8x256xf32, #tpu.memory_space<vmem>>, vector<8x256xf32>,
    } else {
    }
    return
  }
  func.func @transform_0(%arg0: i32, %arg1: i32) -> (i32, i32) {
    %c0_i32 = arith.constant 0 : i32
    %c0_i32_0 = arith.constant 0 : i32
    return %c0_i32, %arg1 : i32, i32
  }
  func.func @transform_1(%arg0: i32, %arg1: i32) -> (i32, i32) {
    %c0_i32 = arith.constant 0 : i32
    return %arg1, %arg0 : i32, i32
  }
  func.func @transform_2(%arg0: i32, %arg1: i32) -> (i32, i32) {
    %c0_i32 = arith.constant 0 : i32
    %c0_i32_0 = arith.constant 0 : i32
    return %c0_i32, %arg0 : i32, i32
  }
  func.func @transform_3(%arg0: i32, %arg1: i32) -> (i32, i32) {
    %c0_i32 = arith.constant 0 : i32
    %c0_i32_0 = arith.constant 0 : i32
    return %c0_i32, %arg0 : i32, i32
  }
  func.func @transform_4(%arg0: i32, %arg1: i32) -> (i32, i32) {
    %c0_i32 = arith.constant 0 : i32
    %c0_i32_0 = arith.constant 0 : i32
    return %c0_i32, %arg0 : i32, i32
  }
  func.func @transform_5(%arg0: i32, %arg1: i32) -> (i32, i32) {
    %c0_i32 = arith.constant 0 : i32
    %c0_i32_0 = arith.constant 0 : i32
    return %c0_i32, %arg0 : i32, i32
  }
}

</mosaic_0001>

<bundles_post_ra>
// kernel: tpu_custom_call.1
= control target key start
LH: loop header
LB: loop body
LE: loop exit
PB: predicated region body
PF: predicated region fallthrough
CT: control target
= control target key end

     0   :  { %s1907_s0 = inlined_call_operand.hbm [shape: bf16[8,512], index: 0, kind: input, shape index: {}]   ;;  %s1908_s1 = inlined_call_operand.hbm [shape: bf16[512,512], index: 1, kind: input, shape index: {}]   ;;  %s1909_s2 = inlined_call_operand.hbm [shape: f32[8,512], index: 2, kind: input, shape index: {}]   ;;  %s1910_s3 = inlined_call_operand.vmem [shape: f32[1,512], index: 3, kind: input, shape index: {}]   ;;  %s1911_s4 = inlined_call_operand.hbm [shape: f32[1,512], index: 4, kind: input, shape index: {}]   ;;  %s1912_s5 = inlined_call_operand.hbm [shape: f32[8,512], index: 5, kind: output, shape index: {}]  }
   0x1   :  { %1922 = sst [smem:[#allocation27_spill]] %s1907_s0 }
   0x2   :  { %1923 = sst [smem:[#allocation28_spill]] %s1908_s1 }
   0x3   :  { %1924 = sst [smem:[#allocation29_spill]] %s1909_s2 }
   0x4   :  { %1925 = sst [smem:[#allocation30_spill]] %s1910_s3 }
   0x5   :  { %1926 = sst [smem:[#allocation31_spill]] %s1911_s4 }
   0x6   :  { %1927 = sst [smem:[#allocation32_spill]] %s1912_s5 }
   0x7   :  { %10 = vsyncpa [#allocation4], 0 }
   0x8   :  { %12 = vsyncpa [#allocation4 + $0x1], 0 }
   0x9   :  { %13 = vsyncpa [#allocation7], 0 }
   0xa   :  { %15 = vsyncpa [#allocation7 + $0x1], 0 }
   0xb   :  { %16 = vsyncpa [#allocation10], 0 }
   0xc   :  { %18 = vsyncpa [#allocation10 + $0x1], 0 }
   0xd   :  { %19 = vsyncpa [#allocation5], 0 }
   0xe   :  { %21 = vsyncpa [#allocation5 + $0x1], 0  ;;  %s1503_s18 = smov 0   ;;  %s1505_s19 = smov 0  }
   0xf   :  { %s1507_s20 = smov 0   ;;  %s1509_s21 = smov 0  }
  0x10   :  { %s1511_s22 = smov 0   ;;  %s1513_s23 = smov 0  }
  0x11   :  { %s1515_s24 = smov 0   ;;  %s1517_s25 = smov 0  }
  0x12   :  { %s1519_s26 = smov 0   ;;  %s1521_s27 = smov 0  }
  0x13   :  { %s1523_s28 = smov 0   ;;  %s1525_s29 = smov 0  }
  0x14   :  { %s1527_s30 = smov 0   ;;  %s1529_s6 = smov 0  }
  0x15 LB: > { %1928 = sst [smem:[#allocation17_spill]] %s1410_s18  ;;  %s36_s7 = sadd.s32 1, %s1454_s29  ;;  %s1462_s6 = sphi %s1529_s6, %s27_s6   ;;  %s1458_s30 = sphi %s1527_s30, %s1985_s30   ;;  %s1454_s29 = sphi %s1525_s29, %s1984_s29   ;;  %s1450_s28 = sphi %s1523_s28, %s1983_s28   ;;  %s1446_s27 = sphi %s1521_s27, %s1972_s27   ;;  %s1442_s26 = sphi %s1519_s26, %s1971_s26   ;;  %s1438_s25 = sphi %s1517_s25, %s1982_s25   ;;  %s1434_s24 = sphi %s1515_s24, %s1981_s24   ;;  %s1430_s23 = sphi %s1513_s23, %s1980_s23   ;;  %s1426_s22 = sphi %s1511_s22, %s1979_s22   ;;  %s1422_s21 = sphi %s1509_s21, %s1978_s21   ;;  %s1418_s20 = sphi %s1507_s20, %s1977_s20   ;;  %s1414_s19 = sphi %s1505_s19, %s1976_s19   ;;  %s1410_s18 = sphi %s1503_s18, %s1968_s18  }
  0x16   : > { %1929 = sst [smem:[#allocation18_spill]] %s1414_s19  ;;  %s39_s8 = sadd.s32 1, %s1458_s30 }
  0x17   : > { %1930 = sst [smem:[#allocation19_spill]] %s1442_s26  ;;  %p37_p0 = scmp.ge.s32.totalorder %s36_s7, 2 }
  0x18   : > { %1931 = sst [smem:[#allocation20_spill]] %s1446_s27  ;;  %p1918_p1 = scmp.eq.s32.totalorder %s1462_s6, 0 }
  0x19   : > { %1932 = sst [smem:[#allocation21_spill]] %s1450_s28  ;;  %s74_s9 = sadd.s32 1, %s1430_s23 }
  0x1a   : > { %1933 = sst [smem:[#allocation22_spill]] %s1454_s29  ;;  %p81_p2 = scmp.ne.s32.totalorder %s1430_s23, %s1426_s22 }
  0x1b   : > { %s1987_s7 = smov (%p37_p0, %s36_s7), 0  ;;  %s1989_s8 = smov (!%p37_p0, %s39_s8), %s1458_s30 }
  0x1c   : > { %1934 = sst [smem:[#allocation23_spill]] %s1987_s7  ;;  %s1584_s10 = ssub.s32 %s1454_s29, %s1987_s7 }
  0x1d   : > { %p1588_p3 = por %p81_p2, %p1918_p1  ;;  %p41_p4 = scmp.ge.s32.totalorder %s1989_s8, 2 }
  0x1e   : > { %p87_p5 = scmp.ne.s32.totalorder %s1426_s22, %s1422_s21  ;;  %p1919_p6 = scmp.lt.s32.totalorder %s1462_s6, 4 }
  0x1f   : > { %s1991_s8 = smov (%p41_p4, %s1989_s8), 0  ;;  %s982_s12 = sshll.u32 %s1454_s29, 7 }
  0x20   : > { %1936 = sst [smem:[#allocation24_spill]] %s1991_s8  ;;  %s234_s13 = sand.u32 1, %s1462_s6  }
  0x21   : > { %s1601_s14 = ssub.s32 %s1458_s30, %s1991_s8  ;;  %s236_s16 = sand.u32 1, %s1430_s23  }
  0x22   : > { %s71_s15 = sor.u32 %s1601_s14, %s1584_s10  ;;  %p98_p7 = scmp.eq.s32.totalorder %s1601_s14, 0 }
  0x23   : > { %p72_p8 = scmp.eq.s32.totalorder %s71_s15, 0  ;;  %s921_s17 = sshll.u32 %s236_s16, 8 }
  0x24   : > { %s923_s7 = sshll.u32 %s1458_s30, 1  ;;  %s238_s28 = scalar_lea.vmem [#allocation6], %s921_s17 }
  0x25   : > { %s1609_s5 = scalar_select %p72_p8, %s1430_s23, %s74_s9  }
  0x26   : > { %s245_s27 = sadd.s32 %s982_s12, %s923_s7  ;;  %s248_s4 = sshll.u32 %s238_s28, 4  ;;  %s249_s4 = int_to_ptr.vmem [resolvable:$true] %s248_s4 }
  0x27   : > { %1937 = sst [smem:[#allocation25_spill]] %s1609_s5  ;;  %s925_s3 = sshll.u32 %s245_s27, 6 }
  0x28   : > { %s1938_s1 = sld [smem:[#allocation28_spill]]  ;;  %p1620_p9 = pnand %p1919_p6, %p1588_p3 }
  0x29   : > { %p932_p10 = scmp.ge.s32.totalorder %s1462_s6, 1  ;;  %s1625_s9 = scalar_lea.sflag [#allocation7], %s234_s13 }
  0x2a   : > { %p1196_p11 = pneg %p1620_p9  ;;  %s1207_s27 = scalar_lea.vmem %s249_s4, 4096 }
  0x2b   : > { %p1208_p12 = scmp.ne.s32.totalorder %s249_s4, %s1207_s27  ;;  %s1464_s28 = smov [#allocation6]  }
  0x2c   : > { %s1212_s2 = sshll.u32 %s1464_s28, 4  ;;  %s1213_s2 = int_to_ptr.vmem [resolvable:$false] %s1212_s2 }
  0x2d   : > { %p1210_p13 = pnand %p1208_p12, %p1196_p11  ;;  %p1215_p2 = scmp.lt.s32.totalorder %s249_s4, %s1213_s2 }
  0x2e   : > { %s247_s8 = scalar_lea.hbm %s1938_s1, %s925_s3  ;;  %s1214_s3 = scalar_lea.vmem %s1213_s2, 8192 }
  0x2f   : > { %p1211_p0 = pneg %p1210_p13  ;;  %p1216_p4 = scmp.lt.s32.totalorder %s1214_s3, %s1207_s27 }
  0x31   : > { %p1217_p3 = por %p1216_p4, %p1215_p2 }
  0x33   : > { %p1218_p8 = pnand %p1217_p3, %p1211_p0 }
  0x35   : > { %1221 = shalt.err (!%p1218_p8)
}
  0x36   : > { %s1465_s18 = smov 256   ;;  %s1466_s7 = smov 128  }
  0x37   : > { %s1467_s11 = smov 8   ;;  %p302_p11 = scmp.lt.s32.totalorder %s1462_s6, 5 }
  0x38   : > { %1003 = dma.hbm_to_vmem [thread:$0]  (!%p1620_p9), %s247_s8, 4096, %s249_s4, %s1625_s9, %s1465_s18, %s1466_s7, %s1467_s11  }
  0x39   : > { %p1635_p12 = pnand %p932_p10, %p302_p11  ;;  %s1640_s15 = sadd.s32 4294967295, %s1462_s6  }
  0x3a   : > { %p44_p13 = scmp.eq.s32.totalorder %s1584_s10, 0  ;;  %s46_s16 = sadd.s32 1, %s1442_s26 }
  0x3b   : > { %p53_p0 = scmp.ne.s32.totalorder %s1442_s26, %s1438_s25  ;;  %p59_p9 = scmp.ne.s32.totalorder %s1438_s25, %s1434_s24 }
  0x3c   : > { %s1647_s17 = scalar_select %p44_p13, %s1442_s26, %s46_s16  }
  0x3d   : > { %p55_p2 = por %p1918_p1, %p53_p0  ;;  %p1917_p4 = scmp.eq.s32.totalorder %s1640_s15, 0 }
  0x3e   : > { %1941 = sst [smem:[#allocation26_spill]] %s1647_s17  ;;  %s215_s4 = sand.u32 1, %s1442_s26  }
  0x3f   : > { %s918_s19 = sshll.u32 %s215_s4, 3  ;;  %p1657_p10 = por %p1917_p4, %p59_p9 }
  0x40   : > { %p1666_p3 = por %p87_p5, %p1917_p4  ;;  %s1944_s0 = sld [smem:[#allocation27_spill]] }
  0x41   : > { %s219_s24 = scalar_lea.vmem [#allocation3], %s918_s19  ;;  %p1677_p8 = pnand %p1919_p6, %p55_p2 }
  0x42   : > { %s227_s3 = sshll.u32 %s219_s24, 4  ;;  %s216_s7 = scalar_lea.sflag [#allocation4], %s215_s4  ;;  %s228_s3 = int_to_ptr.vmem [resolvable:$true] %s227_s3 }
  0x43   : > { %p1224_p5 = pneg %p1677_p8  ;;  %s1235_s21 = scalar_lea.vmem %s228_s3, 128 }
  0x44   : > { %p1236_p11 = scmp.ne.s32.totalorder %s228_s3, %s1235_s21  ;;  %s1468_s11 = smov [#allocation3]  }
  0x45   : > { %s1240_s16 = sshll.u32 %s1468_s11, 4  ;;  %s1241_s16 = int_to_ptr.vmem [resolvable:$false] %s1240_s16 }
  0x46   : > { %s225_s2 = scalar_lea.hbm %s1944_s0, %s982_s12  ;;  %p1238_p13 = pnand %p1236_p11, %p1224_p5 }
  0x47   : > { %s1242_s12 = scalar_lea.vmem %s1241_s16, 256  ;;  %p1243_p9 = scmp.lt.s32.totalorder %s228_s3, %s1241_s16 }
  0x48   : > { %p1239_p0 = pneg %p1238_p13  ;;  %p1244_p4 = scmp.lt.s32.totalorder %s1242_s12, %s1235_s21 }
  0x4a   : > { %p1245_p1 = por %p1244_p4, %p1243_p9 }
  0x4c   : > { %p1246_p2 = pnand %p1245_p1, %p1239_p0 }
  0x4e   : > { %1249 = shalt.err (!%p1246_p2)
}
  0x4f   : > { %s1946_s4 = sld [smem:[#allocation18_spill]]  ;;  %s915_s10 = sadd.s32 4294967294, %s1462_s6  }
  0x50   : > { %s1947_s19 = sld [smem:[#allocation17_spill]]  ;;  %s100_s28 = sadd.s32 1, %s1418_s20 }
  0x51   : > { %1000 = dma.hbm_to_vmem [thread:$0]  (!%p1677_p8), %s225_s2, 128, %s228_s3, %s216_s7  }
  0x52   : > { %s1690_s24 = scalar_select %p98_p7, %s1418_s20, %s100_s28  }
  0x53   : > { %p189_p5 = scmp.eq.s32.totalorder %s1640_s15, 3  ;;  %p195_p11 = scmp.eq.s32.totalorder %s915_s10, 3 }
  0x54   : > { %p1948_p13 = scmp.eq.s32.totalorder %s1462_s6, 0  ;;  %p1949_p9 = scmp.eq.s32.totalorder %s1640_s15, 0 }
  0x55   : > { %p107_p1 = scmp.ne.s32.totalorder %s1418_s20, %s1946_s4  ;;  %s1714_s14 = sand.u32 1, %s1418_s20  }
  0x56   : > { %p113_p4 = scmp.ne.s32.totalorder %s1946_s4, %s1947_s19  ;;  %s984_s3 = sshll.u32 %s1458_s30, 8 }
  0x57   : > { %p109_p0 = por %p107_p1, %p1948_p13  ;;  %p1705_p6 = por %p189_p5, %p107_p1 }
  0x58   : > { %p1701_p2 = por %p113_p4, %p1949_p9  ;;  %p1709_p8 = por %p195_p11, %p113_p4 }
  0x59   : > { %s926_s7 = sshll.u32 %s1714_s14, 4  ;;  %s1953_s12 = sld [smem:[#allocation29_spill]] }
  0x5a   : > { %s1952_s2 = scalar_select %p1709_p8, 1, 0 }
  0x5b   : > { %p1954_p7 = scmp.lt.s32.totalorder %s1462_s6, 4  ;;  %s262_s10 = scalar_lea.vmem [#allocation8], %s926_s7 }
  0x5c   : > { %s270_s28 = sshll.u32 %s262_s10, 4  ;;  %s1469_s11 = smov [#allocation8]   ;;  %s271_s28 = int_to_ptr.vmem [resolvable:$true] %s270_s28 }
  0x5d   : > { %p1723_p13 = pnand %p1954_p7, %p109_p0  ;;  %s1263_s0 = scalar_lea.vmem %s271_s28, 256 }
  0x5e   : > { %p1264_p4 = scmp.ne.s32.totalorder %s271_s28, %s1263_s0 }
  0x5f   : > { %s268_s4 = scalar_lea.hbm %s1953_s12, %s984_s3  ;;  %p1252_p1 = pneg %p1723_p13 }
  0x60   : > { %s1268_s3 = sshll.u32 %s1469_s11, 4  ;;  %s1269_s3 = int_to_ptr.vmem [resolvable:$false] %s1268_s3 }
  0x61   : > { %p1266_p5 = pnand %p1264_p4, %p1252_p1  ;;  %s1270_s16 = scalar_lea.vmem %s1269_s3, 512 }
  0x62   : > { %p1271_p0 = scmp.lt.s32.totalorder %s271_s28, %s1269_s3  ;;  %p1272_p9 = scmp.lt.s32.totalorder %s1270_s16, %s1263_s0 }
  0x63   : > { %p1267_p11 = pneg %p1266_p5 }
  0x64   : > { %p1273_p7 = por %p1272_p9, %p1271_p0 }
  0x66   : > { %p1274_p8 = pnand %p1273_p7, %p1267_p11 }
  0x68   : > { %1277 = shalt.err (!%p1274_p8)
}
  0x69   : > { %1006 = dma.hbm_to_vmem [thread:$0]  (!%p1723_p13), %s268_s4, 256, %s271_s28, %s1625_s9  }
  0x6a   : > { %s929_s7 = sshll.u32 %s1714_s14, 1  ;;  %s985_s12 = sshll.u32 %s1458_s30, 5 }
  0x6b   : > { %s1956_s11 = sld [smem:[#allocation31_spill]]  ;;  %s289_s17 = scalar_lea.vmem [#allocation9], %s929_s7 }
  0x6c   : > { %s297_s3 = sshll.u32 %s289_s17, 4  ;;  %s286_s0 = scalar_lea.sflag [#allocation10], %s1714_s14  ;;  %s298_s3 = int_to_ptr.vmem [resolvable:$true] %s297_s3 }
  0x6d   : > { %s1291_s16 = scalar_lea.vmem %s298_s3, 32  ;;  %s1470_s26 = smov [#allocation9]  }
  0x6e   : > { %p1292_p8 = scmp.ne.s32.totalorder %s298_s3, %s1291_s16  ;;  %s1296_s5 = sshll.u32 %s1470_s26, 4  ;;  %s1297_s5 = int_to_ptr.vmem [resolvable:$false] %s1296_s5 }
  0x6f   : > { %s1298_s9 = scalar_lea.vmem %s1297_s5, 64  ;;  %p1299_p11 = scmp.lt.s32.totalorder %s298_s3, %s1297_s5 }
  0x70   : > { %p1294_p4 = pnand %p1292_p8, %p1252_p1  ;;  %p1300_p0 = scmp.lt.s32.totalorder %s1298_s9, %s1291_s16 }
  0x71   : > { %s295_s29 = scalar_lea.hbm %s1956_s11, %s985_s12 }
  0x72   : > { %p1295_p5 = pneg %p1294_p4  ;;  %p1301_p9 = por %p1300_p0, %p1299_p11 }
  0x74   : > { %p1302_p7 = pnand %p1301_p9, %p1295_p5 }
  0x76   : > { %1305 = shalt.err (!%p1302_p7)
}
  0x77   : > { %1009 = dma.hbm_to_vmem [thread:$0]  (!%p1723_p13), %s295_s29, 32, %s298_s3, %s286_s0  }
  0x78   : > { %306 = sbr.rel (%p1635_p12) target bundleno = 543 (0x21f), region = 40  ;;  %s308_s1 = sand.u32 (!%p1635_p12), 1, %s1438_s25  }
  0x79   : > { %s1749_s17 = sshll.u32 (!%p1635_p12), %s308_s1, 3  ;;  %s309_s26 = scalar_lea.sflag (!%p1635_p12), [#allocation4], %s308_s1 }
  0x7a   : > { %s312_s14 = scalar_lea.vmem (!%p1635_p12), [#allocation3], %s1749_s17 }
  0x7d   : > { %1389 = dma.done.wait (%p1657_p10), %s309_s26, 128  }
  0x7e   : > { %1391 = vsyncadd (%p1657_p10), %s309_s26, 4294967168  ;;  %s317_s5 = sand.u32 1, %s1640_s15   ;;  %s319_s29 = sand.u32 1, %s1426_s22  }
  0x7f   : > { %s934_s13 = sshll.u32 %s319_s29, 8  ;;  %s318_s4 = scalar_lea.sflag [#allocation7], %s317_s5 }
  0x80   : > { %s1758_s19 = scalar_lea.vmem [#allocation6], %s934_s13 }
  0x81   : > { %1393 = dma.done.wait (%p1666_p3), %s318_s4, 4096  }
  0x82   : > { %1395 = vsyncadd (%p1666_p3), %s318_s4, 4294963200  ;;  %s1957_s28 = sld [smem:[#allocation18_spill]] }
  0x88   : > { %s1765_s7 = sand.u32 1, %s1957_s28  }
  0x89   : > { %s935_s8 = sshll.u32 %s1765_s7, 4 }
  0x8a   : > { %s1768_s12 = scalar_lea.vmem [#allocation8], %s935_s8 }
  0x8b   : > { %1397 = dma.done.wait (%p1701_p2), %s318_s4, 256  }
  0x8c   : > { %1399 = vsyncadd (%p1701_p2), %s318_s4, 4294967040  ;;  %s936_s15 = sshll.u32 %s1765_s7, 1  ;;  %s336_s10 = scalar_lea.sflag [#allocation10], %s1765_s7 }
  0x8d   : > { %s1776_s27 = scalar_lea.vmem [#allocation9], %s936_s15 }
  0x8e   : > { %1401 = dma.done.wait (%p1701_p2), %s336_s10, 32  }
  0x8f   : > { %1403 = vsyncadd (%p1701_p2), %s336_s10, 4294967264  ;;  %s1958_s11 = sld [smem:[#allocation21_spill]]  ;;  %s1789_s26 = scalar_lea.vmem [#allocation11], %s935_s8 }
  0x90   : > { %s1959_s9 = sld [smem:[#allocation30_spill]] }
  0x91   : > { %s1960_s5 = sld [smem:[#allocation20_spill]] }
  0x95   : > { %s938_s3 = sshll.u32 %s1958_s11, 1 }
  0x96   : > { %p390_p12 = scmp.lt.s32.totalorder %s938_s3, 3 }
  0x97   : > { %p939_p10 = scmp.ne.s32.totalorder %s1960_s5, 0 }
  0x98   : > { %s1993_s3 = smov (!%p390_p12, %s938_s3), 3 }
  0x99   : > { %s392_s1 = scalar_lea.vmem %s1959_s9, %s1993_s3  ;;  %399 = sbr.rel (%p939_p10) target bundleno = 160 (0xa0), region = 60 }
  0x9e   : > { %v1471_v0 = vmov 0.0  }
  0x9f   : > { %400 = vst [vmem:[#allocation2] sm:$0xff] %v1471_v0  ;;  %401 = vst [vmem:[#allocation2 + $0x8] sm:$0xff] %v1471_v0 }
  0xa0 PF: > { %v1132_v1 = vld [vmem:[%s1758_s19 + $0x74] ss:$8 sps:$4 sm:$0xff]   ;;  %v1134_v2 = vld [vmem:[%s1758_s19 + $0x70] ss:$8 sps:$4 sm:$0xff]   ;;  %v1135_v3 = vld [vmem:[%s1758_s19 + $0x64] ss:$8 sps:$4 sm:$0xff]  }
  0xa1   : > { %604 = vmatprep.subr.bf16.mxu0 %v1132_v1  ;;  %v1137_v4 = vld [vmem:[%s1758_s19 + $0x60] ss:$8 sps:$4 sm:$0xff]   ;;  %v1138_v5 = vld [vmem:[%s1758_s19 + $0x54] ss:$8 sps:$4 sm:$0xff]   ;;  %v1140_v6 = vld [vmem:[%s1758_s19 + $0x50] ss:$8 sps:$4 sm:$0xff]  }
  0xa2   : > { %605 = vmatpush1.bf16.msra.mxu0 %v1134_v2  ;;  %v1141_v7 = vld [vmem:[%s1758_s19 + $0x44] ss:$8 sps:$4 sm:$0xff]   ;;  %v1143_v8 = vld [vmem:[%s1758_s19 + $0x40] ss:$8 sps:$4 sm:$0xff]   ;;  %v1144_v9 = vld [vmem:[%s1758_s19 + $0x34] ss:$8 sps:$4 sm:$0xff]  }
  0xa3   : > { %606 = vmatprep.subr.bf16.mxu0 %v1135_v3  ;;  %v1146_v10 = vld [vmem:[%s1758_s19 + $0x30] ss:$8 sps:$4 sm:$0xff]   ;;  %v1147_v11 = vld [vmem:[%s1758_s19 + $0x24] ss:$8 sps:$4 sm:$0xff]   ;;  %v1149_v12 = vld [vmem:[%s1758_s19 + $0x20] ss:$8 sps:$4 sm:$0xff]  }
  0xa4   : > { %v1150_v13 = vld [vmem:[%s1758_s19 + $0x14] ss:$8 sps:$4 sm:$0xff]   ;;  %v1152_v16 = vld [vmem:[%s1758_s19 + $0x10] ss:$8 sps:$4 sm:$0xff]   ;;  %v1153_v17 = vld [vmem:[%s1758_s19 + $0x4] ss:$8 sps:$4 sm:$0xff]  }
  0xa5   : > { %v404_v14 = vld [vmem:[%s312_s14] sm:$0xff]  ;;  %v1155_v18 = vld [vmem:[%s1758_s19] ss:$8 sps:$4 sm:$0xff]   ;;  %v1159_v21 = vld [vmem:[%s1758_s19 + $0xe4] ss:$8 sps:$4 sm:$0xff]   ;;  %s1961_s18 = sld [smem:[#allocation20_spill]] }
  0xa6   : > { %607 = vmatpush1.bf16.msra.mxu0 %v1137_v4  ;;  %v941_v15 = vcombine.high %v404_v14, %v404_v14  ;;  %v1156_v19 = vld [vmem:[%s1758_s19 + $0xf4] ss:$8 sps:$4 sm:$0xff]   ;;  %v1158_v20 = vld [vmem:[%s1758_s19 + $0xf0] ss:$8 sps:$4 sm:$0xff]   ;;  %v1161_v22 = vld [vmem:[%s1758_s19 + $0xe0] ss:$8 sps:$4 sm:$0xff]   ;;  %v940_v35 = vcombine.low %v404_v14, %v404_v14 }
  0xa7   : > { %608 = vmatprep.subr.bf16.mxu0 %v1138_v5  ;;  %v1162_v23 = vld [vmem:[%s1758_s19 + $0xd4] ss:$8 sps:$4 sm:$0xff]   ;;  %v1164_v24 = vld [vmem:[%s1758_s19 + $0xd0] ss:$8 sps:$4 sm:$0xff]   ;;  %v1165_v25 = vld [vmem:[%s1758_s19 + $0xc4] ss:$8 sps:$4 sm:$0xff]  }
  0xa8   : > { %636 = vmatprep.mubr.bf16.mxu0 %v941_v15  ;;  %v1167_v26 = vld [vmem:[%s1758_s19 + $0xc0] ss:$8 sps:$4 sm:$0xff]   ;;  %v1168_v27 = vld [vmem:[%s1758_s19 + $0xb4] ss:$8 sps:$4 sm:$0xff]   ;;  %v1170_v28 = vld [vmem:[%s1758_s19 + $0xb0] ss:$8 sps:$4 sm:$0xff]  }
  0xa9   : > { %v1171_v29 = vld [vmem:[%s1758_s19 + $0xa4] ss:$8 sps:$4 sm:$0xff]   ;;  %v1173_v30 = vld [vmem:[%s1758_s19 + $0xa0] ss:$8 sps:$4 sm:$0xff]   ;;  %v1174_v31 = vld [vmem:[%s1758_s19 + $0x94] ss:$8 sps:$4 sm:$0xff]  }
  0xaa   : > { %609 = vmatpush1.bf16.msra.mxu0 %v1140_v6  ;;  %v1176_v32 = vld [vmem:[%s1758_s19 + $0x90] ss:$8 sps:$4 sm:$0xff]   ;;  %v1177_v33 = vld [vmem:[%s1758_s19 + $0x84] ss:$8 sps:$4 sm:$0xff]   ;;  %v1179_v34 = vld [vmem:[%s1758_s19 + $0x80] ss:$8 sps:$4 sm:$0xff]  }
  0xab   : > { %610 = vmatprep.subr.bf16.mxu0 %v1141_v7  ;;  %v402_v36 = vld [vmem:[#allocation2] sm:$0xff]  ;;  %v403_v38 = vld [vmem:[#allocation2 + $0x8] sm:$0xff]  ;;  %p974_p3 = scmp.ne.s32.totalorder %s1961_s18, 1 }
  0xae   : > { %611 = vmatpush1.bf16.msra.mxu0 %v1143_v8 }
  0xaf   : > { %612 = vmatprep.subr.bf16.mxu0 %v1144_v9 }
  0xb2   : > { %613 = vmatpush1.bf16.msra.mxu0 %v1146_v10 }
  0xb3   : > { %614 = vmatprep.subr.bf16.mxu0 %v1147_v11 }
  0xb6   : > { %615 = vmatpush1.bf16.msra.mxu0 %v1149_v12 }
  0xb7   : > { %616 = vmatprep.subr.bf16.mxu0 %v1150_v13 }
  0xba   : > { %617 = vmatpush1.bf16.msra.mxu0 %v1152_v16 }
  0xbb   : > { %618 = vmatprep.subr.bf16.mxu0 %v1153_v17 }
  0xbe   : > { %619 = vmatpush1.bf16.msra.mxu0 %v1155_v18 }
  0xbf   : > { %620 = vmatprep.subr.bf16.mxu0 %v1156_v19 }
  0xc2   : > { %621 = vmatpush2.bf16.msra.mxu0 %v1158_v20 }
  0xc3   : > { %622 = vmatprep.subr.bf16.mxu0 %v1159_v21 }
  0xc6   : > { %623 = vmatpush2.bf16.msra.mxu0 %v1161_v22 }
  0xc7   : > { %624 = vmatprep.subr.bf16.mxu0 %v1162_v23 }
  0xca   : > { %625 = vmatpush2.bf16.msra.mxu0 %v1164_v24 }
  0xcb   : > { %626 = vmatprep.subr.bf16.mxu0 %v1165_v25 }
  0xce   : > { %627 = vmatpush2.bf16.msra.mxu0 %v1167_v26 }
  0xcf   : > { %628 = vmatprep.subr.bf16.mxu0 %v1168_v27 }
  0xd2   : > { %629 = vmatpush2.bf16.msra.mxu0 %v1170_v28 }
  0xd3   : > { %630 = vmatprep.subr.bf16.mxu0 %v1171_v29 }
  0xd6   : > { %631 = vmatpush2.bf16.msra.mxu0 %v1173_v30 }
  0xd7   : > { %632 = vmatprep.subr.bf16.mxu0 %v1174_v31 }
  0xda   : > { %633 = vmatpush2.bf16.msra.mxu0 %v1176_v32 }
  0xdb   : > { %634 = vmatprep.subr.bf16.mxu0 %v1177_v33 }
  0xde   : > { %635 = vmatpush2.bf16.msra.mxu0 %v1179_v34 }
  0xe1   : > { %637 = vmatmul.mubr.bf16.vlgmr.msra.gmra.mxu0 %v940_v35 }
 0x1a1   : > { %v638_v37 = vpop.f32.mrf.mxu0 }
 0x1a2   : > { %v645_v39 = vadd.f32 %v638_v37, %v402_v36 }
 0x1a3   : > { %v640_v40 = vpop.f32.mrf.mxu0  ;;  %652 = sbr.rel (%p974_p3) target bundleno = 519 (0x207), region = 64 }
 0x1a4   : > { %647 = vst [vmem:[#allocation2] sm:$0xff] %v645_v39  ;;  %v646_v41 = vadd.f32 %v640_v40, %v403_v38 }
 0x1a5   : > { %v642_v42 = vpop.f32.mrf.mxu0 }
 0x1a6   : > { %648 = vst [vmem:[#allocation2 + $0x8] sm:$0xff] %v646_v41 }
 0x1a7   : > { %v643_v43 = vpop.f32.mrf.mxu0 }
 0x1a8   : > { %v696_v16 = vlaneseq  ;;  %v694_v19 = vld [vmem:[%s392_s1] sm:$0x3]  ;;  %v735_v41 = vld [vmem:[%s1768_s12 + $0x8] sm:$0xff] }
 0x1a9   : > { %v708_v21 = vld [vmem:[%s1776_s27] sm:$0x3] }
 0x1aa   : > { %v697_v17 = vshrl.u32 %v696_v16, 7  ;;  %v734_v40 = vld [vmem:[%s1768_s12] sm:$0xff] }
 0x1ab   : > { %v653_v44 = vld [vmem:[#allocation2] sm:$0xff] }
 0x1ac   : > { %v655_v45 = vrot.slane %v653_v44, 4  ;;  %v698_v18 = vsub.s32 0, %v697_v17  ;;  %v702_v20 = vsub.s32 1, %v697_v17 }
 0x1ad   : > { %v654_v46 = vld [vmem:[#allocation2 + $0x8] sm:$0xff] }
 0x1ae   : > { %v661_v47 = vrot.slane %v654_v46, 4  ;;  %v656_v48 = vadd.f32 %v655_v45, %v653_v44  ;;  %v699_v22 = vrot.slane %v694_v19, %v698_v18  ;;  %v703_v24 = vrot.slane %v694_v19, %v702_v20 }
 0x1af   : > { %v713_v27 = vrot.slane %v708_v21, %v698_v18  ;;  %v717_v29 = vrot.slane %v708_v21, %v702_v20 }
 0x1b0   : > { %v662_v49 = vadd.f32 %v661_v47, %v654_v46  ;;  %v657_v50 = vrot.slane %v656_v48, 2 }
 0x1b2   : > { %v663_v51 = vrot.slane %v662_v49, 2  ;;  %v658_v52 = vadd.f32 %v657_v50, %v656_v48 }
 0x1b4   : > { %v664_v53 = vadd.f32 %v663_v51, %v662_v49  ;;  %v659_v54 = vrot.slane %v658_v52, 1 }
 0x1b6   : > { %v665_v55 = vrot.slane %v664_v53, 1  ;;  %v660_v56 = vadd.f32 %v659_v54, %v658_v52 }
 0x1b8   : > { %v666_v57 = vadd.f32 %v665_v55, %v664_v53  ;;  %v668_v58 = vmul.f32 0.125, %v660_v56 }
 0x1ba   : > { %v669_v59 = vmul.f32 0.125, %v666_v57  ;;  %v670_v60 = vsub.f32 %v653_v44, %v668_v58 }
 0x1bc   : > { %v671_v61 = vsub.f32 %v654_v46, %v669_v59  ;;  %v672_v62 = vmul.f32 %v670_v60, %v670_v60 }
 0x1be   : > { %v673_v63 = vmul.f32 %v671_v61, %v671_v61  ;;  %v674_v0 = vrot.slane %v672_v62, 4 }
 0x1c0   : > { %v680_v1 = vrot.slane %v673_v63, 4  ;;  %v675_v2 = vadd.f32 %v674_v0, %v672_v62 }
 0x1c2   : > { %v681_v3 = vadd.f32 %v680_v1, %v673_v63  ;;  %v676_v4 = vrot.slane %v675_v2, 2 }
 0x1c4   : > { %v682_v5 = vrot.slane %v681_v3, 2  ;;  %v677_v6 = vadd.f32 %v676_v4, %v675_v2 }
 0x1c6   : > { %v683_v7 = vadd.f32 %v682_v5, %v681_v3  ;;  %v678_v8 = vrot.slane %v677_v6, 1 }
 0x1c8   : > { %v684_v9 = vrot.slane %v683_v7, 1  ;;  %v679_v10 = vadd.f32 %v678_v8, %v677_v6 }
 0x1ca   : > { %v685_v11 = vadd.f32 %v684_v9, %v683_v7  ;;  %v686_v12 = vmul.f32 0.125, %v679_v10 }
 0x1cc   : > { %v687_v13 = vmul.f32 0.125, %v685_v11  ;;  %v688_v14 = vadd.f32 1e-05, %v686_v12 }
 0x1ce   : > { %v689_v15 = vadd.f32 1e-05, %v687_v13  ;;  %1182 = vrsqrt.f32 %v688_v14 }
 0x1d0   : > { %1184 = vrsqrt.f32 %v689_v15 }
 0x1db   : > { %v1183_v23 = vpop.eup %1182 }
 0x1dc   : > { %v692_v26 = vmul.f32 %v1183_v23, %v670_v60 }
 0x1dd   : > { %v1185_v25 = vpop.eup %1184 }
 0x1de   : > { %v693_v28 = vmul.f32 %v1185_v25, %v671_v61  ;;  %v706_v30 = vmul.f32 %v699_v22, %v692_v26 }
 0x1e0   : > { %v707_v31 = vmul.f32 %v703_v24, %v693_v28  ;;  %v720_v32 = vadd.f32 %v713_v27, %v706_v30 }
 0x1e2   : > { %v721_v33 = vadd.f32 %v717_v29, %v707_v31  ;;  %v975_v34 = vmul.f32 -1.442695, %v720_v32 }
 0x1e4   : > { %v976_v35 = vmul.f32 -1.442695, %v721_v33  ;;  %1186 = vpow2.f32 %v975_v34 }
 0x1e6   : > { %1188 = vpow2.f32 %v976_v35 }
 0x1f1   : > { %v1187_v36 = vpop.eup %1186 }
 0x1f2   : > { %v728_v38 = vadd.f32 1.0, %v1187_v36 }
 0x1f3   : > { %v1189_v37 = vpop.eup %1188 }
 0x1f4   : > { %v729_v39 = vadd.f32 1.0, %v1189_v37  ;;  %1190 = vrcp.f32 %v728_v38 }
 0x1f6   : > { %1192 = vrcp.f32 %v729_v39 }
 0x201   : > { %v1191_v42 = vpop.eup %1190 }
 0x202   : > { %v736_v44 = vmul.f32 %v1191_v42, %v734_v40 }
 0x203   : > { %v1193_v43 = vpop.eup %1192 }
 0x204   : > { %v737_v45 = vmul.f32 %v1193_v43, %v735_v41  ;;  %738 = vst [vmem:[%s1789_s26] sm:$0xff] %v736_v44 }
 0x206   : > { %739 = vst [vmem:[%s1789_s26 + $0x8] sm:$0xff] %v737_v45 }
 0x207 PF: > { %s1963_s13 = sld [smem:[#allocation21_spill]]  ;;  %s755_s10 = sshll.u32 %s1789_s26, 4  ;;  %s756_s10 = int_to_ptr.vmem [resolvable:$true] %s755_s10 }
 0x208   : > { %s1964_s8 = sld [smem:[#allocation32_spill]]  ;;  %s741_s27 = scalar_lea.sflag [#allocation5], %s1765_s7 }
 0x209   : > { %s1306_s12 = scalar_lea.vmem %s756_s10, 256  ;;  %s1472_s11 = smov [#allocation11]  }
 0x20a   : > { %p1307_p2 = scmp.ne.s32.totalorder %s756_s10, %s1306_s12  ;;  %s1310_s3 = sshll.u32 %s1472_s11, 4  ;;  %s1311_s3 = int_to_ptr.vmem [resolvable:$false] %s1310_s3 }
 0x20b   : > { %s1312_s0 = scalar_lea.vmem %s1311_s3, 512  ;;  %p1313_p8 = scmp.lt.s32.totalorder %s756_s10, %s1311_s3 }
 0x20c   : > { %p1308_p13 = pnand %p1307_p2, %p1705_p6  ;;  %p1314_p4 = scmp.lt.s32.totalorder %s1312_s0, %s1306_s12 }
 0x20d   : > { %s986_s4 = sshll.u32 %s1963_s13, 8 }
 0x20e   : > { %s753_s15 = scalar_lea.hbm %s1964_s8, %s986_s4  ;;  %p1309_p1 = pneg %p1308_p13 }
 0x20f   : > { %p1315_p5 = por %p1314_p4, %p1313_p8 }
 0x211   : > { %p1316_p11 = pnand %p1315_p5, %p1309_p1 }
 0x213   : > { %1319 = shalt.err (!%p1316_p11)
}
 0x214   : > { %s1320_s16 = scalar_lea.hbm %s753_s15, 256  ;;  %s1324_s1 = scalar_lea.hbm %s1964_s8, 512 }
 0x215   : > { %p1321_p0 = scmp.ne.s32.totalorder %s753_s15, %s1320_s16  ;;  %p1325_p12 = scmp.lt.s32.totalorder %s753_s15, %s1964_s8 }
 0x216   : > { %p1326_p10 = scmp.lt.s32.totalorder %s1324_s1, %s1320_s16 }
 0x217   : > { %p1322_p9 = pnand %p1321_p0, %p1705_p6 }
 0x218   : > { %p1327_p3 = por %p1326_p10, %p1325_p12 }
 0x219   : > { %p1323_p7 = pneg %p1322_p9 }
 0x21b   : > { %p1328_p2 = pnand %p1327_p3, %p1323_p7 }
 0x21d   : > { %1331 = shalt.err (!%p1328_p2)
}
 0x21e   : > { %995 = dma.vmem_to_hbm [thread:$0]  (%p1705_p6), %s756_s10, 256, %s753_s15, %s741_s27  }
 0x21f PF: > { %s1965_s18 = sld [smem:[#allocation17_spill]]  ;;  %p1015_p13 = scmp.ge.s32.totalorder %s1462_s6, 2 }
 0x220   : > { %p1966_p1 = scmp.ne.s32.totalorder %s1952_s2, 0 }
 0x222   : > { %p1011_p8 = pnand %p1015_p13, %p1966_p1 }
 0x224   : > { %p1012_p4 = pneg %p1011_p8 }
 0x225   : > { %s767_s17 = sand.u32 1, %s1965_s18  }
 0x226   : > { %s768_s14 = scalar_lea.sflag [#allocation5], %s767_s17 }
 0x227   : > { %1405 = dma.done.wait (%p1012_p4), %s768_s14, 256  }
 0x228   : > { %1407 = vsyncadd (%p1012_p4), %s768_s14, 4294967040  ;;  %s27_s6 = sadd.s32 1, %s1462_s6   ;;  %s1968_s18 = sld [smem:[#allocation18_spill]] }
 0x229   : > { %p1860_p5 = scmp.ge.s32.totalorder %s27_s6, 6   ;;  %s1969_s13 = sld [smem:[#allocation25_spill]] }
 0x22a   : > { %s1970_s4 = sld [smem:[#allocation19_spill]]  ;;  %s1976_s19 = smov %s1418_s20 }
 0x22b   : > { %s1971_s26 = sld [smem:[#allocation26_spill]]  ;;  %s1977_s20 = smov %s1690_s24 }
 0x22c   : > { %s1972_s27 = sld [smem:[#allocation22_spill]]  ;;  %s1978_s21 = smov %s1426_s22 }
 0x22d   : > { %s1973_s2 = sld [smem:[#allocation23_spill]]  ;;  %s1979_s22 = smov %s1430_s23 }
 0x22e   : > { %s1974_s15 = sld [smem:[#allocation24_spill]]  ;;  %s1981_s24 = smov %s1438_s25 }
 0x22f   : > { %s1980_s23 = smov %s1969_s13  ;;  %s1983_s28 = smov %s1458_s30 }
 0x230   : > { %s1982_s25 = smov %s1970_s4  ;;  %26 = sbr.rel (!%p1860_p5) target bundleno = 21 (0x15), region = 133 }
 0x233   : > { %s1984_s29 = smov %s1973_s2 }
 0x234   : > { %s1985_s30 = smov %s1974_s15 }
 0x235   :  { %773 = vsyncpa [#allocation4], 1 }
 0x236   :  { %775 = vsyncpa [#allocation4 + $0x1], 1 }
 0x237   :  { %776 = vsyncpa [#allocation7], 1 }
 0x238   :  { %778 = vsyncpa [#allocation7 + $0x1], 1 }
 0x239   :  { %779 = vsyncpa [#allocation10], 1 }
 0x23a   :  { %781 = vsyncpa [#allocation10 + $0x1], 1 }
 0x23b   :  { %782 = vsyncpa [#allocation5], 1 }
 0x23c   :  { %784 = vsyncpa [#allocation5 + $0x1], 1 }

</bundles_post_ra>
